<compile_context>
chip_gen: v5e
topology: v5e:2x2
jax: 0.10.0
libtpu: 0.0.40
codegen_flags: <defaults>
</compile_context>

<pallas_src>
import functools

import jax
import jax.numpy as jnp
from jax.experimental import pallas as pl
from jax.experimental.pallas import tpu as pltpu


def _round_up(x, m):
    return ((x + m - 1) // m) * m


def _cdiv(a, b):
    return (a + b - 1) // b


def _lr_kernel_single_k(x_ref, w_ref, b_ref, o_ref, *, apply_sigmoid):
    # x_ref: (tm, D_in)  w_ref: (D_in, tn)  b_ref: (1, tn)  o_ref: (tm, tn)
    # Single reduction step: no accumulator scratch, fused bias + activation.
    z = jnp.dot(x_ref[...], w_ref[...], preferred_element_type=jnp.float32)
    z = z + b_ref[...]                      # bias kept in f32
    if apply_sigmoid:
        z = jax.nn.sigmoid(z)               # routed through EUP
    o_ref[...] = z.astype(o_ref.dtype)


def _lr_kernel_multi_k(x_ref, w_ref, b_ref, o_ref, acc_ref, *, apply_sigmoid):
    # x_ref: (tm, tk)  w_ref: (tk, tn)  b_ref: (1, tn)  o_ref/acc_ref: (tm, tn)
    k = pl.program_id(2)

    @pl.when(k == 0)
    def _():
        # Fold the bias into the accumulator init (saves an epilogue add).
        acc_ref[...] = jnp.broadcast_to(b_ref[...], acc_ref.shape)

    acc_ref[...] += jnp.dot(x_ref[...], w_ref[...],
                            preferred_element_type=jnp.float32)

    @pl.when(k == pl.num_programs(2) - 1)
    def _():
        z = acc_ref[...]
        if apply_sigmoid:
            z = jax.nn.sigmoid(z)
        o_ref[...] = z.astype(o_ref.dtype)


def lr_forward(x, weight, bias=None, for_classif=True, *,
               tm=512, tn=None, tk=2048, compute_dtype=None,
               allow_xla_fallback=False):
    """Pallas implementation of LR.forward: out_activation(x @ W.T + b).

    x:      (B, D_in)      float32 (or bf16 via compute_dtype)
    weight: (D_out, D_in)  PyTorch nn.Linear layout
    bias:   (D_out,) or None
    returns (B, D_out)
    """
    orig_dtype = x.dtype
    B, D_in = x.shape
    D_out = weight.shape[0]

    # Tiny-shape escape hatch (opt-in): a single-block problem is dominated by
    # pallas_call launch + DMA setup; the fused XLA op is strictly faster.
    if allow_xla_fallback and B <= 256 and D_in <= 256 and D_out <= 256:
        z = x @ weight.T + (0.0 if bias is None else bias)
        return (jax.nn.sigmoid(z) if for_classif else z).astype(orig_dtype)

    if compute_dtype is not None:
        # Optional numerics-affecting cast (halves HBM traffic, native MXU rate).
        x = x.astype(compute_dtype)
        weight = weight.astype(compute_dtype)
    itemsize = x.dtype.itemsize

    # Lane-dense output width (multiple of 128); padded cols are sliced off.
    N_p = _round_up(D_out, 128)

    # One-time pre-transpose + N-pad of the (small) weight; no in-kernel .T.
    w_t = jnp.zeros((D_in, N_p), weight.dtype).at[:, :D_out].set(weight.T)

    b_p = jnp.zeros((1, N_p), jnp.float32)
    if bias is not None:
        b_p = b_p.at[0, :D_out].set(bias.astype(jnp.float32))

    # ---- tile selection ----------------------------------------------------
    VMEM_BUDGET = 48 << 20      # safe on v7x (64 MiB physical per TC)
    VMEM_DEFAULT = 32 << 20     # scoped default; only raise when needed
    K_SINGLE_MAX = 4096         # use a single full-extent K block below this

    if tn is None:
        tn = 512
    tn = min(_round_up(tn, 128), N_p)

    tm = min(_round_up(max(tm, 8), 8), _round_up(B, 8))

    # v7x megacore: guarantee >= 2 parallel grid blocks when there is enough
    # batch to split.  No effect on single-TC v5e/v6e.
    if _cdiv(B, tm) * _cdiv(N_p, tn) < 2 and B >= 16:
        tm = max(8, _round_up(_cdiv(B, 2), 8))

    single_k = D_in <= K_SINGLE_MAX

    def vmem_est(tm_, tk_, with_acc):
        est = 2 * (tm_ * tk_ + tk_ * tn) * itemsize        # x, W (double buf)
        est += 2 * tm_ * tn * jnp.dtype(orig_dtype).itemsize  # out (double buf)
        est += 2 * tn * 4                                   # bias
        if with_acc:
            est += tm_ * tn * 4                             # f32 accumulator
        return est

    if single_k:
        tk = D_in
    else:
        tk = min(_round_up(tk, 128), _round_up(D_in, 128))
    while vmem_est(tm, tk, not single_k) > VMEM_BUDGET and tm > 8:
        tm = max(8, _round_up(tm // 2, 8))
    est = vmem_est(tm, tk, not single_k)
    vmem_limit = None if est <= VMEM_DEFAULT else int(min(VMEM_BUDGET,
                                                          est + (2 << 20)))
    cp_kwargs = {} if vmem_limit is None else {"vmem_limit_bytes": vmem_limit}

    cost = pl.CostEstimate(
        flops=2 * B * D_in * D_out,
        transcendentals=B * D_out if for_classif else 0,
        bytes_accessed=(B * D_in + D_in * D_out + B * D_out) * itemsize)

    num_i = _cdiv(B, tm)
    num_j = _cdiv(N_p, tn)

    if single_k:
        # Grid (j, i): W block (0, j) is constant across batch tiles -> stays
        # VMEM-resident while x streams; x itself is never padded or copied.
        out_p = pl.pallas_call(
            functools.partial(_lr_kernel_single_k, apply_sigmoid=for_classif),
            out_shape=jax.ShapeDtypeStruct((B, N_p), orig_dtype),
            grid_spec=pltpu.PrefetchScalarGridSpec(
                num_scalar_prefetch=0,
                grid=(num_j, num_i),
                in_specs=[
                    pl.BlockSpec((tm, D_in), lambda j, i: (i, 0)),   # x
                    pl.BlockSpec((D_in, tn), lambda j, i: (0, j)),   # W (pre-T)
                    pl.BlockSpec((1, tn), lambda j, i: (0, j)),      # bias
                ],
                out_specs=pl.BlockSpec((tm, tn), lambda j, i: (i, j)),
            ),
            compiler_params=pltpu.CompilerParams(
                dimension_semantics=("parallel", "parallel"), **cp_kwargs),
            cost_estimate=cost,
        )(x, w_t, b_p)
    else:
        # Large-D_in fallback: k-innermost reduction with an f32 accumulator.
        K_p = _round_up(D_in, tk)
        if K_p != D_in:
            # Rare (huge, ragged D_in): zero-pad K once; exact result.
            x = jnp.zeros((B, K_p), x.dtype).at[:, :D_in].set(x)
            w_t = jnp.zeros((K_p, N_p), w_t.dtype).at[:D_in].set(w_t)
        out_p = pl.pallas_call(
            functools.partial(_lr_kernel_multi_k, apply_sigmoid=for_classif),
            out_shape=jax.ShapeDtypeStruct((B, N_p), orig_dtype),
            grid_spec=pltpu.PrefetchScalarGridSpec(
                num_scalar_prefetch=0,
                grid=(num_j, num_i, K_p // tk),
                in_specs=[
                    pl.BlockSpec((tm, tk), lambda j, i, k: (i, k)),   # x
                    pl.BlockSpec((tk, tn), lambda j, i, k: (k, j)),   # W (pre-T)
                    pl.BlockSpec((1, tn), lambda j, i, k: (0, j)),    # bias
                ],
                out_specs=pl.BlockSpec((tm, tn), lambda j, i, k: (i, j)),
                scratch_shapes=[pltpu.VMEM((tm, tn), jnp.float32)],
            ),
            compiler_params=pltpu.CompilerParams(
                dimension_semantics=("parallel", "parallel", "arbitrary"),
                **cp_kwargs),
            cost_estimate=cost,
        )(x, w_t, b_p)

    if N_p != D_out:
        out_p = out_p[:, :D_out]
    return out_p


if __name__ == "__main__":
    key = jax.random.PRNGKey(0)
    kx, kw, kb, kx2, kw2, kb2 = jax.random.split(key, 6)

    # Case 1: LR(dim_input=32, dim_output=16), batch 8.
    B, D_in, D_out = 8, 32, 16
    x = jax.random.normal(kx, (B, D_in), dtype=jnp.float32)
    limit = 1.0 / jnp.sqrt(jnp.float32(D_in))
    weight = jax.random.uniform(kw, (D_out, D_in), minval=-limit, maxval=limit,
                                dtype=jnp.float32)
    bias = jax.random.uniform(kb, (D_out,), minval=-limit, maxval=limit,
                              dtype=jnp.float32)

    # for_classif=True (Linear + Sigmoid)
    out = jax.block_until_ready(lr_forward(x, weight, bias, for_classif=True))
    ref = jax.nn.sigmoid(x @ weight.T + bias)
    assert out.shape == (B, D_out)
    assert jnp.allclose(out, ref, atol=1e-5, rtol=1e-5)

    # for_classif=False (Linear + Identity)
    out_id = jax.block_until_ready(lr_forward(x, weight, bias,
                                              for_classif=False))
    ref_id = x @ weight.T + bias
    assert jnp.allclose(out_id, ref_id, atol=1e-5, rtol=1e-5)

    # Case 2: ragged batch / feature sizes — exercises partial edge blocks,
    # the >=2-parallel-block split, and the no-padded-x path.
    B2, D_in2, D_out2 = 100, 48, 10
    x2 = jax.random.normal(kx2, (B2, D_in2), dtype=jnp.float32)
    limit2 = 1.0 / jnp.sqrt(jnp.float32(D_in2))
    w2 = jax.random.uniform(kw2, (D_out2, D_in2), minval=-limit2, maxval=limit2,
                            dtype=jnp.float32)
    b2 = jax.random.uniform(kb2, (D_out2,), minval=-limit2, maxval=limit2,
                            dtype=jnp.float32)

    out2 = jax.block_until_ready(lr_forward(x2, w2, b2, for_classif=True))
    ref2 = jax.nn.sigmoid(x2 @ w2.T + b2)
    assert out2.shape == (B2, D_out2)
    assert jnp.allclose(out2, ref2, atol=1e-5, rtol=1e-5)

    print("KERNEL_OK")
</pallas_src>

<mosaic_0001>
module attributes {stable_mosaic.version = 11 : i64} {
  func.func @_lr_kernel_single_k(%arg0: i32, %arg1: i32, %arg2: memref<8x32xf32, #tpu.memory_space<vmem>>, %arg3: memref<32x128xf32, #tpu.memory_space<vmem>>, %arg4: memref<1x128xf32, #tpu.memory_space<vmem>>, %arg5: memref<8x128xf32, #tpu.memory_space<vmem>>) attributes {dimension_semantics = [#tpu.dimension_semantics<parallel>, #tpu.dimension_semantics<parallel>], iteration_bounds = array<i64: 1, 1>, scalar_prefetch = 0 : i64, scratch_operands = 0 : i64, tpu.core_type = #tpu.core_type<tc>, window_params = [{transform_indices = @transform_0, window_bounds = array<i64: 8, 32>}, {transform_indices = @transform_1, window_bounds = array<i64: 32, 128>}, {transform_indices = @transform_2, window_bounds = array<i64: 1, 128>}, {transform_indices = @transform_3, window_bounds = array<i64: 8, 128>}]} {
    %c0 = arith.constant 0 : index
    %c0_0 = arith.constant 0 : index
    %0 = vector.load %arg2[%c0, %c0_0] : memref<8x32xf32, #tpu.memory_space<vmem>>, vector<8x32xf32>
    %c0_1 = arith.constant 0 : index
    %c0_2 = arith.constant 0 : index
    %1 = vector.load %arg3[%c0_1, %c0_2] : memref<32x128xf32, #tpu.memory_space<vmem>>, vector<32x128xf32>
    %cst = arith.constant dense<0.000000e+00> : vector<8x128xf32>
    %2 = tpu.matmul %0, %1, %cst {dimension_numbers = #tpu.dot_dimension_numbers<[1], [0], [0], [1], [0, 0, 1, 1], [], []>} : vector<8x32xf32>, vector<32x128xf32>, vector<8x128xf32> -> vector<8x128xf32>
    %c0_3 = arith.constant 0 : index
    %c0_4 = arith.constant 0 : index
    %3 = vector.load %arg4[%c0_3, %c0_4] : memref<1x128xf32, #tpu.memory_space<vmem>>, vector<1x128xf32>
    %4 = vector.broadcast %3 : vector<1x128xf32> to vector<8x128xf32>
    %5 = arith.addf %2, %4 : vector<8x128xf32>
    %6 = arith.negf %5 : vector<8x128xf32>
    %7 = math.exp %6 : vector<8x128xf32>
    %cst_5 = arith.constant 1.000000e+00 : f32
    %8 = vector.broadcast %cst_5 : f32 to vector<8x128xf32>
    %9 = arith.addf %8, %7 : vector<8x128xf32>
    %10 = arith.divf %8, %9 : vector<8x128xf32>
    %c0_6 = arith.constant 0 : index
    %c0_7 = arith.constant 0 : index
    %11 = vector.load %arg5[%c0_6, %c0_7] : memref<8x128xf32, #tpu.memory_space<vmem>>, vector<8x128xf32>
    tpu.vector_store %arg5[%c0_6, %c0_7], %10 {strides = array<i32>} : memref<8x128xf32, #tpu.memory_space<vmem>>, vector<8x128xf32>,
    return
  }
  func.func @transform_0(%arg0: i32, %arg1: i32) -> (i32, i32) {
    %c0_i32 = arith.constant 0 : i32
    %c0_i32_0 = arith.constant 0 : i32
    return %arg1, %c0_i32 : i32, i32
  }
  func.func @transform_1(%arg0: i32, %arg1: i32) -> (i32, i32) {
    %c0_i32 = arith.constant 0 : i32
    %c0_i32_0 = arith.constant 0 : i32
    return %c0_i32, %arg0 : i32, i32
  }
  func.func @transform_2(%arg0: i32, %arg1: i32) -> (i32, i32) {
    %c0_i32 = arith.constant 0 : i32
    %c0_i32_0 = arith.constant 0 : i32
    return %c0_i32, %arg0 : i32, i32
  }
  func.func @transform_3(%arg0: i32, %arg1: i32) -> (i32, i32) {
    %c0_i32 = arith.constant 0 : i32
    return %arg1, %arg0 : i32, i32
  }
}

</mosaic_0001>

<bundles_post_ra>
// kernel: tpu_custom_call.1
= control target key start
LH: loop header
LB: loop body
LE: loop exit
PB: predicated region body
PF: predicated region fallthrough
CT: control target
= control target key end

     0   :  { %8 = vsyncpa [#allocation3], 0  ;;  %s243_s0 = inlined_call_operand.hbm [shape: f32[8,32], index: 0, kind: input, shape index: {}]   ;;  %s244_s1 = inlined_call_operand.hbm [shape: f32[32,128], index: 1, kind: input, shape index: {}]   ;;  %s245_s2 = inlined_call_operand.vmem [shape: f32[1,128], index: 2, kind: input, shape index: {}]   ;;  %s246_s3 = inlined_call_operand.hbm [shape: f32[8,128], index: 3, kind: output, shape index: {}]  }
   0x1   :  { %9 = vsyncpa [#allocation6], 0 }
   0x2   :  { %10 = vsyncpa [#allocation4], 0  ;;  %s16_s14 = sshll.u32 %s243_s0, 4  ;;  %s206_s15 = smov [#allocation2]   ;;  %s17_s14 = int_to_ptr.hbm [resolvable:$true] %s16_s14 }
   0x3   :  { %s18_s16 = sshll.u32 %s206_s15, 4  ;;  %s26_s19 = sshll.u32 %s244_s1, 4  ;;  %s19_s16 = int_to_ptr.vmem [resolvable:$true] %s18_s16  ;;  %s27_s19 = int_to_ptr.hbm [resolvable:$true] %s26_s19 }
   0x4   :  { %21 = dma.hbm_to_vmem [thread:$0]  %s17_s14, 128, %s19_s16, [#allocation3]  }
   0x5   :  { %s207_s20 = smov [#allocation5]   ;;  %s208_s22 = smov 128  }
   0x6   :  { %s28_s21 = sshll.u32 %s207_s20, 4  ;;  %s209_s23 = smov 8   ;;  %s29_s21 = int_to_ptr.vmem [resolvable:$true] %s28_s21 }
   0x7   :  { %34 = dma.hbm_to_vmem [thread:$0]  %s27_s19, 512, %s29_s21, [#allocation6], %s208_s22, %s208_s22, %s209_s23  }
   0x8   :  { %200 = dma.done.wait [#allocation3], 128  }
   0x9   :  { %201 = vsyncadd [#allocation3], 4294967168 }
   0xa   :  { %202 = dma.done.wait [#allocation6], 512  }
   0xb   :  { %203 = vsyncadd [#allocation6], 4294966784  ;;  %v49_v0 = vld [vmem:[#allocation5 + $0x18] sm:$0xff]  ;;  %v48_v1 = vld [vmem:[#allocation5 + $0x10] sm:$0xff]  ;;  %vm54_vm0 = vcmask 261120   ;;  %s210_s24 = smov [#allocation7]  }
   0xc   :  { %70 = vmatpush.msra.mxu0 %v49_v0  ;;  %v47_v2 = vld [vmem:[#allocation5 + $0x8] sm:$0xff]  ;;  %v46_v3 = vld [vmem:[#allocation5] sm:$0xff]  ;;  %v45_v4 = vld [vmem:[#allocation2] sm:$0xff]  ;;  %s103_s25 = sshll.u32 %s210_s24, 4  ;;  %s104_s25 = int_to_ptr.vmem [resolvable:$true] %s103_s25 }
   0xd   :  { %v123_v5 = vld [vmem:[%s245_s2] ss:$0 sm:$0xff]  ;;  %s105_s2 = sshll.u32 %s246_s3, 4  ;;  %s106_s2 = int_to_ptr.hbm [resolvable:$true] %s105_s2 }
   0xe   :  { %71 = vmatpush.msra.mxu0 %v48_v1 }
  0x10   :  { %72 = vmatpush.msra.mxu0 %v47_v2 }
  0x12   :  { %73 = vmatpush.msra.mxu0 %v46_v3 }
  0x13   :  { %116 = vmatmul.msk.f32.vlgmr.msra.gmra.mxu0 %vm54_vm0, %v45_v4 }
  0x90   :  { %v75_v6 = vpop.f32.mrf.mxu0 }
  0x91   :  { %v76_v7 = vadd.f32 %v123_v5, %v75_v6 }
  0x93   :  { %v117_v8 = vmul.f32 -1.442695, %v76_v7 }
  0x95   :  { %124 = vpow2.f32 %v117_v8 }
  0x9b   :  { %v125_v9 = vpop.eup %124 }
  0x9c   :  { %v81_v10 = vadd.f32 1.0, %v125_v9 }
  0x9e   :  { %126 = vrcp.f32 %v81_v10  ;;  %v93_v14 = vand.u32 2147483648, %v81_v10  ;;  %v91_v16 = vand.u32 2147483647, %v81_v10  ;;  %vm87_vm2 = vweird.f32 %v81_v10 }
  0xa0   :  { %v94_v18 = vor.u32 1.1754944e-38, %v93_v14  ;;  %vm92_vm4 = vcmp.eq.f32.partialorder %v91_v16, 8.507059e+37 }
  0xa4   :  { %v127_v11 = vpop.eup %126 }
  0xa5   :  { %v83_v12 = vmul.f32 %v127_v11, %v81_v10  ;;  %vm88_vm1 = vweird.f32 %v127_v11 }
  0xa6   :  { %vm89_vm3 = vmor %vm87_vm2, %vm88_vm1 }
  0xa7   :  { %v84_v13 = vsub.f32 1.0, %v83_v12 }
  0xa9   :  { %v85_v15 = vmul.f32 %v127_v11, %v84_v13 }
  0xab   :  { %v86_v17 = vadd.f32 %v127_v11, %v85_v15 }
  0xad   :  { %v90_v19 = vsel %vm89_vm3, %v127_v11, %v86_v17 }
  0xae   :  { %v95_v20 = vsel %vm92_vm4, %v94_v18, %v90_v19 }
  0xaf   :  { %97 = vst [vmem:[#allocation7] sm:$0xff] %v95_v20 }
  0xb0   :  { %108 = dma.vmem_to_hbm [thread:$0]  %s104_s25, 128, %s106_s2, [#allocation4]  }
  0xb1   :  { %204 = dma.done.wait [#allocation4], 128  }
  0xb2   :  { %205 = vsyncadd [#allocation4], 4294967168 }
  0xb3   :  { %113 = vsyncpa [#allocation3], 1 }
  0xb4   :  { %114 = vsyncpa [#allocation6], 1 }
  0xb5   :  { %115 = vsyncpa [#allocation4], 1 }

</bundles_post_ra>
